<compile_context>
chip_gen: v5e
topology: v5e:2x2
jax: 0.10.0
libtpu: 0.0.40
codegen_flags: <defaults>
</compile_context>

<pallas_src>
import math

import jax
import jax.numpy as jnp
from jax.experimental import pallas as pl
from jax.experimental.pallas import tpu as pltpu


def lstm_attention_kernel(x_ref, w_ref, p_ref):
    # x_ref: (L+1, R)   rows [0:L) = h, row L = d
    # w_ref: (R+1, 3R)  rows [0:R)  = [h2h_w^T | d2h_w^T | C_w^T]
    #                   row  R      = [h2h_b + d2h_b | C_b | V_w]
    # p_ref: (1, R)     one softmax row (broadcast to (L, R) in the wrapper)
    L = x_ref.shape[0] - 1
    R = x_ref.shape[1]

    x = x_ref[...]                                   # (L+1, R) f32
    w = w_ref[0:R, :]                                # (R, 3R)
    brow = w_ref[R:R + 1, :]                         # (1, 3R)
    bias_hd = brow[:, 0:R]                           # (1, R)  h2h_b + d2h_b
    bc = brow[:, R:2 * R]                            # (1, R)  C_b
    wv = brow[:, 2 * R:3 * R]                        # (1, R)  V weight row

    # Single MXU pass: Y = X @ W_all -> (L+1, 3R)
    y = jnp.dot(x, w, preferred_element_type=jnp.float32)

    yh = y[0:L, 0:R]                                 # h @ Wh^T          (L, R)
    yd = y[L:L + 1, R:2 * R]                         # d @ Wd^T          (1, R)
    yhc = y[0:L, 2 * R:3 * R]                        # h @ Wc^T          (L, R)
    ydc = y[L:L + 1, 2 * R:3 * R]                    # d @ Wc^T          (1, R)

    # e = tanh(h@Wh^T + d@Wd^T + bh + bd); d-term broadcasts over the L rows
    # (d.unsqueeze(1).expand_as(h) in the torch code).
    e = jnp.tanh(yh + yd + bias_hd)                  # (L, R)  EUP

    # u = V(e): lane-wise mul + reduce.  V bias omitted: it adds a constant to
    # every attention logit and cancels exactly in the softmax over L below.
    u = jnp.sum(e * wv, axis=1, keepdims=True)       # (L, 1)

    # a = softmax(u) over the attention (L) axis.
    u_max = jnp.max(u, axis=0, keepdims=True)
    a = jnp.exp(u - u_max)
    a = a / jnp.sum(a, axis=0, keepdims=True)        # (L, 1)

    # logits = (d + att_res) @ Wc^T + C_b
    #        = d@Wc^T + (sum_l a_l h_l)@Wc^T + C_b = ydc + a^T . yhc + bc
    # -> no MXU op after the softmax; just a VPU mul + XLU sublane reduce.
    logits = ydc + jnp.sum(a * yhc, axis=0, keepdims=True) + bc         # (1, R)
    m = jnp.max(logits, axis=1, keepdims=True)
    ex = jnp.exp(logits - m)
    p_ref[...] = (ex / jnp.sum(ex, axis=1, keepdims=True)).astype(p_ref.dtype)


def pack_params(params):
    """Pre-transpose + pack all weights/biases ONCE into a single (R+1, 3R) slab."""
    R = params["h2h_w"].shape[0]
    w_all = jnp.concatenate(
        [params["h2h_w"].T, params["d2h_w"].T, params["C_w"].T], axis=1
    ).astype(jnp.float32)                                               # (R, 3R)
    bias_row = jnp.concatenate(
        [params["h2h_b"] + params["d2h_b"],   # fused tanh-preactivation bias
         params["C_b"],
         params["V_w"].reshape(R)],           # V weight as a row; V bias cancels
        axis=0,
    ).astype(jnp.float32).reshape(1, 3 * R)                             # (1, 3R)
    return jnp.concatenate([w_all, bias_row], axis=0)                   # (R+1, 3R)


@jax.jit
def lstm_attention(h, d, w_packed):
    """h: (1, L, R), d: (1, R) -> p: (L, R) (batch_size == 1 semantics)."""
    B, L, R = h.shape
    # Hard guard: the module's `d + att_res` broadcast (and this kernel's
    # single-row shortcut) are only valid for batch_size == 1.
    assert B == 1, "lstm_attention kernel implements batch_size == 1 semantics only"

    # Pack d as the last row of the h slab -> one input DMA instead of two.
    x = jnp.concatenate(
        [h.reshape(L, R), d.reshape(1, R)], axis=0
    ).astype(jnp.float32)                                               # (L+1, R)

    vmem = pl.BlockSpec(memory_space=pltpu.MemorySpace.VMEM)
    prow = pl.pallas_call(
        lstm_attention_kernel,
        out_shape=jax.ShapeDtypeStruct((1, R), jnp.float32),
        in_specs=[vmem, vmem],
        out_specs=vmem,
    )(x, w_packed)
    # All L output rows are identical for batch_size == 1; broadcast lazily in XLA.
    return jnp.broadcast_to(prow, (L, R))


def _init_linear(key, out_f, in_f):
    # PyTorch nn.Linear default init: U(-k, k), k = 1/sqrt(in_features)
    k = 1.0 / math.sqrt(in_f)
    kw, kb = jax.random.split(key)
    w = jax.random.uniform(kw, (out_f, in_f), jnp.float32, -k, k)
    b = jax.random.uniform(kb, (out_f,), jnp.float32, -k, k)
    return w, b


def _reference(h, d, params):
    # Pure-JAX reference of the PyTorch forward (batch_size == 1), incl. V bias.
    _, L, R = h.shape
    h2 = h.reshape(L, R)
    d_exp = jnp.broadcast_to(d.reshape(1, R), (L, R))
    lin = lambda x, w, b: x @ w.T + b
    u = lin(jnp.tanh(lin(h2, params["h2h_w"], params["h2h_b"])
                     + lin(d_exp, params["d2h_w"], params["d2h_b"])),
            params["V_w"], params["V_b"])                     # (L, 1)
    a = jax.nn.softmax(u.reshape(1, L), axis=1).reshape(L, 1)
    att_res = jnp.sum(h2 * a, axis=0, keepdims=True)          # (1, R)
    return jax.nn.softmax(lin(d_exp + att_res, params["C_w"], params["C_b"]), axis=1)


if __name__ == "__main__":
    rnn_size = 32
    att_size = 8
    batch = 1   # module's `d + att_res` only broadcasts for batch_size == 1

    key = jax.random.PRNGKey(0)
    k_h, k_d, k1, k2, k3, k4 = jax.random.split(key, 6)
    h = jax.random.normal(k_h, (batch, att_size, rnn_size), jnp.float32)
    d = jax.random.normal(k_d, (batch, rnn_size), jnp.float32)

    h2h_w, h2h_b = _init_linear(k1, rnn_size, rnn_size)
    d2h_w, d2h_b = _init_linear(k2, rnn_size, rnn_size)
    V_w, V_b = _init_linear(k3, 1, rnn_size)
    C_w, C_b = _init_linear(k4, rnn_size, rnn_size)
    params = dict(h2h_w=h2h_w, h2h_b=h2h_b, d2h_w=d2h_w, d2h_b=d2h_b,
                  V_w=V_w, V_b=V_b, C_w=C_w, C_b=C_b)

    # Pack/transposed params once (hoisted out of the call path).
    w_packed = jax.block_until_ready(pack_params(params))

    p = lstm_attention(h, d, w_packed)
    p = jax.block_until_ready(p)

    p_ref = _reference(h, d, params)
    assert p.shape == (att_size, rnn_size)
    assert jnp.allclose(p, p_ref, atol=2e-5, rtol=2e-5), "mismatch vs pure-JAX reference"
    print("KERNEL_OK")
</pallas_src>

<mosaic_0001>
module attributes {stable_mosaic.version = 11 : i64} {
  func.func @lstm_attention_kernel(%arg0: memref<9x32xf32, #tpu.memory_space<vmem>>, %arg1: memref<33x96xf32, #tpu.memory_space<vmem>>, %arg2: memref<1x32xf32, #tpu.memory_space<vmem>>) attributes {dimension_semantics = [], scalar_prefetch = 0 : i64, scratch_operands = 0 : i64, tpu.core_type = #tpu.core_type<tc>} {
    %c0 = arith.constant 0 : index
    %c0_0 = arith.constant 0 : index
    %0 = vector.load %arg0[%c0, %c0_0] : memref<9x32xf32, #tpu.memory_space<vmem>>, vector<9x32xf32>
    %c0_1 = arith.constant 0 : index
    %c0_2 = arith.constant 0 : index
    %1 = vector.load %arg1[%c0_1, %c0_2] : memref<33x96xf32, #tpu.memory_space<vmem>>, vector<32x96xf32>
    %c32 = arith.constant 32 : index
    %c0_3 = arith.constant 0 : index
    %2 = vector.load %arg1[%c32, %c0_3] : memref<33x96xf32, #tpu.memory_space<vmem>>, vector<1x96xf32>
    %3 = vector.extract_strided_slice %2 {offsets = [0, 0], sizes = [1, 32], strides = [1, 1]} : vector<1x96xf32> to vector<1x32xf32>
    %4 = vector.extract_strided_slice %2 {offsets = [0, 32], sizes = [1, 32], strides = [1, 1]} : vector<1x96xf32> to vector<1x32xf32>
    %5 = vector.extract_strided_slice %2 {offsets = [0, 64], sizes = [1, 32], strides = [1, 1]} : vector<1x96xf32> to vector<1x32xf32>
    %cst = arith.constant dense<0.000000e+00> : vector<9x96xf32>
    %6 = tpu.matmul %0, %1, %cst {dimension_numbers = #tpu.dot_dimension_numbers<[1], [0], [0], [1], [0, 0, 1, 1], [], []>} : vector<9x32xf32>, vector<32x96xf32>, vector<9x96xf32> -> vector<9x96xf32>
    %7 = vector.extract_strided_slice %6 {offsets = [0, 0], sizes = [8, 32], strides = [1, 1]} : vector<9x96xf32> to vector<8x32xf32>
    %8 = vector.extract_strided_slice %6 {offsets = [8, 32], sizes = [1, 32], strides = [1, 1]} : vector<9x96xf32> to vector<1x32xf32>
    %9 = vector.extract_strided_slice %6 {offsets = [0, 64], sizes = [8, 32], strides = [1, 1]} : vector<9x96xf32> to vector<8x32xf32>
    %10 = vector.extract_strided_slice %6 {offsets = [8, 64], sizes = [1, 32], strides = [1, 1]} : vector<9x96xf32> to vector<1x32xf32>
    %11 = vector.broadcast %8 : vector<1x32xf32> to vector<8x32xf32>
    %12 = arith.addf %7, %11 : vector<8x32xf32>
    %13 = vector.broadcast %3 : vector<1x32xf32> to vector<8x32xf32>
    %14 = arith.addf %12, %13 : vector<8x32xf32>
    %15 = math.tanh %14 : vector<8x32xf32>
    %16 = vector.broadcast %5 : vector<1x32xf32> to vector<8x32xf32>
    %17 = arith.mulf %15, %16 : vector<8x32xf32>
    %cst_4 = arith.constant dense<0.000000e+00> : vector<8xf32>
    %18 = vector.multi_reduction <add>, %17, %cst_4 [1] : vector<8x32xf32> to vector<8xf32>
    %19 = vector.shape_cast %18 : vector<8xf32> to vector<8x1xf32>
    %cst_5 = arith.constant dense<0xFF800000> : vector<1xf32>
    %20 = vector.multi_reduction <maximumf>, %19, %cst_5 [0] : vector<8x1xf32> to vector<1xf32>
    %21 = vector.shape_cast %20 : vector<1xf32> to vector<1x1xf32>
    %22 = vector.broadcast %21 : vector<1x1xf32> to vector<8x1xf32>
    %23 = arith.subf %19, %22 : vector<8x1xf32>
    %24 = math.exp %23 : vector<8x1xf32>
    %cst_6 = arith.constant dense<0.000000e+00> : vector<1xf32>
    %25 = vector.multi_reduction <add>, %24, %cst_6 [0] : vector<8x1xf32> to vector<1xf32>
    %26 = vector.shape_cast %25 : vector<1xf32> to vector<1x1xf32>
    %27 = vector.broadcast %26 : vector<1x1xf32> to vector<8x1xf32>
    %28 = arith.divf %24, %27 : vector<8x1xf32>
    %29 = vector.broadcast %28 : vector<8x1xf32> to vector<8x32xf32>
    %30 = arith.mulf %29, %9 : vector<8x32xf32>
    %cst_7 = arith.constant dense<0.000000e+00> : vector<32xf32>
    %31 = vector.multi_reduction <add>, %30, %cst_7 [0] : vector<8x32xf32> to vector<32xf32>
    %32 = vector.shape_cast %31 : vector<32xf32> to vector<1x32xf32>
    %33 = arith.addf %10, %32 : vector<1x32xf32>
    %34 = arith.addf %33, %4 : vector<1x32xf32>
    %cst_8 = arith.constant dense<0xFF800000> : vector<1xf32>
    %35 = vector.multi_reduction <maximumf>, %34, %cst_8 [1] : vector<1x32xf32> to vector<1xf32>
    %36 = vector.shape_cast %35 : vector<1xf32> to vector<1x1xf32>
    %37 = vector.broadcast %36 : vector<1x1xf32> to vector<1x32xf32>
    %38 = arith.subf %34, %37 : vector<1x32xf32>
    %39 = math.exp %38 : vector<1x32xf32>
    %cst_9 = arith.constant dense<0.000000e+00> : vector<1xf32>
    %40 = vector.multi_reduction <add>, %39, %cst_9 [1] : vector<1x32xf32> to vector<1xf32>
    %41 = vector.shape_cast %40 : vector<1xf32> to vector<1x1xf32>
    %42 = vector.broadcast %41 : vector<1x1xf32> to vector<1x32xf32>
    %43 = arith.divf %39, %42 : vector<1x32xf32>
    %c0_10 = arith.constant 0 : index
    %c0_11 = arith.constant 0 : index
    %44 = vector.load %arg2[%c0_10, %c0_11] : memref<1x32xf32, #tpu.memory_space<vmem>>, vector<1x32xf32>
    tpu.vector_store %arg2[%c0_10, %c0_11], %43 {strides = array<i32>} : memref<1x32xf32, #tpu.memory_space<vmem>>, vector<1x32xf32>,
    return
  }
}

</mosaic_0001>

<bundles_post_ra>
// kernel: lstm_attention.1
= control target key start
LH: loop header
LB: loop body
LE: loop exit
PB: predicated region body
PF: predicated region fallthrough
CT: control target
= control target key end

     0   :  { %7 = vsyncpa [#allocation3], 0  ;;  %s215_s12 = smov [#allocation2]   ;;  %s216_s14 = smov 128   ;;  %s260_s0 = inlined_call_operand.vmem [shape: f32[9,32], index: 0, kind: input, shape index: {}]   ;;  %s261_s1 = inlined_call_operand.hbm [shape: f32[33,96], index: 1, kind: input, shape index: {}]   ;;  %s262_s2 = inlined_call_operand.vmem [shape: f32[1,32], index: 2, kind: output, shape index: {}]  }
   0x1   :  { %s14_s11 = sshll.u32 %s261_s1, 4  ;;  %s16_s13 = sshll.u32 %s215_s12, 4  ;;  %s15_s11 = int_to_ptr.hbm [resolvable:$true] %s14_s11  ;;  %s17_s13 = int_to_ptr.vmem [resolvable:$true] %s16_s13 }
   0x2   :  { %s217_s15 = smov 8  }
   0x3   :  { %22 = dma.hbm_to_vmem [thread:$0]  %s15_s11, 640, %s17_s13, [#allocation3], %s216_s14, %s216_s14, %s217_s15  }
   0x4   :  { %213 = dma.done.wait [#allocation3], 640  }
   0x5   :  { %214 = vsyncadd [#allocation3], 4294966656  ;;  %v32_v0 = vld [vmem:[#allocation2 + $0x18] sm:$0xff]  ;;  %v31_v1 = vld [vmem:[#allocation2 + $0x10] sm:$0xff]  ;;  %vm34_vm0 = vcmask 261120   ;;  %s218_s19 = smov 96  }
   0x6   :  { %168 = vmatpush.msra.mxu1 %v32_v0  ;;  %53 = vmatpush.msra.mxu0 %v32_v0  ;;  %v30_v2 = vld [vmem:[#allocation2 + $0x8] sm:$0xff]  ;;  %v29_v3 = vld [vmem:[#allocation2] sm:$0xff]  ;;  %s219_s20 = smov 64   ;;  %vm112_vm5 = vcmask 785920   ;;  %vm126_vm6 = vcmask 778752   ;;  %vm137_vm7 = vcmask 253952  }
   0x7   :  { %v28_v4 = vld [vmem:[%s260_s0 + $0x8] sm:$0x1]  ;;  %v27_v5 = vld [vmem:[%s260_s0] sm:$0xff]  ;;  %s220_s0 = smov 32  }
   0x8   :  { %169 = vmatpush.msra.mxu1 %v31_v1  ;;  %54 = vmatpush.msra.mxu0 %v31_v1  ;;  %v178_v8 = vld [vmem:[#allocation2 + $0x20] ss:$0 sm:$0xff] }
   0x9   :  { %v33_v17 = vld [vmem:[#allocation2 + $0x20] sm:$0x1] }
   0xa   :  { %170 = vmatpush.msra.mxu1 %v30_v2  ;;  %55 = vmatpush.msra.mxu0 %v30_v2 }
   0xc   :  { %171 = vmatpush.msra.mxu1 %v29_v3  ;;  %56 = vmatpush.msra.mxu0 %v29_v3 }
   0xd   :  { %167 = vmatmul.msk.f32.vlgmr.msra.gmra.mxu1 %vm34_vm0, %v28_v4  ;;  %166 = vmatmul.msk.f32.vlgmr.msra.gmra.mxu0 %vm34_vm0, %v27_v5 }
  0x8a   :  { %v247_v6 = vpop.f32.mrf.mxu1  ;;  %v58_v9 = vpop.f32.mrf.mxu0 }
  0x8b   :  { %v64_v7 = vperm.slane %v247_v6, 0 }
  0x8d   :  { %66 = vrot.lane.b32.xlu0 %v64_v7, %s218_s19 }
  0x95   :  { %74 = vrot.lane.b32.xlu0 %v178_v8, %s219_s20 }
  0xff   :  { %v67_v10 = vpop.permute.xlu0 %66 }
 0x100   :  { %v69_v11 = vadd.f32 %v67_v10, %v58_v9 }
 0x102   :  { %v71_v12 = vadd.f32 %v178_v8, %v69_v11 }
 0x104   :  { %179 = vtanh.f32 %v71_v12 }
 0x107   :  { %v75_v13 = vpop.permute.xlu0 %74 }
 0x10a   :  { %v180_v14 = vpop.eup %179 }
 0x10b   :  { %v77_v15 = vmul.f32 %v180_v14, %v75_v13 }
 0x10d   :  { %v78_v16 = vsel %vm34_vm0, %v77_v15, 0.0 }
 0x10e   :  { %79 = vadd.xlane.f32.xlu1 %v78_v16 }
 0x127   :  { %122 = vrot.lane.b32.xlu1 %v33_v17, %s220_s0 }
 0x181   :  { %v80_v18 = vpop.xlane.xlu1 %79 }
 0x182   :  { %v81_v19 = vrot.slane %v80_v18, 4 }
 0x184   :  { %v82_v20 = vmax.f32 %v80_v18, %v81_v19 }
 0x186   :  { %v83_v21 = vrot.slane %v82_v20, 2 }
 0x188   :  { %v84_v22 = vmax.f32 %v82_v20, %v83_v21 }
 0x18a   :  { %v85_v23 = vrot.slane %v84_v22, 1 }
 0x18c   :  { %v86_v24 = vmax.f32 %v84_v22, %v85_v23 }
 0x18e   :  { %v87_v25 = vsub.f32 %v80_v18, %v86_v24 }
 0x190   :  { %v88_v26 = vmul.f32 1.442695, %v87_v25 }
 0x192   :  { %181 = vpow2.f32 %v88_v26 }
 0x198   :  { %v182_v27 = vpop.eup %181 }
 0x199   :  { %v90_v28 = vrot.slane %v182_v27, 4  ;;  %v123_v53 = vpop.permute.xlu1 %122 }
 0x19b   :  { %v91_v29 = vadd.f32 %v182_v27, %v90_v28 }
 0x19d   :  { %v92_v30 = vrot.slane %v91_v29, 2 }
 0x19f   :  { %v93_v31 = vadd.f32 %v92_v30, %v91_v29 }
 0x1a1   :  { %v94_v32 = vrot.slane %v93_v31, 1 }
 0x1a3   :  { %v95_v33 = vadd.f32 %v94_v32, %v93_v31 }
 0x1a5   :  { %183 = vrcp.f32 %v95_v33  ;;  %v107_v37 = vand.u32 2147483648, %v95_v33  ;;  %v105_v39 = vand.u32 2147483647, %v95_v33  ;;  %vm101_vm2 = vweird.f32 %v95_v33 }
 0x1a7   :  { %v108_v41 = vor.u32 1.1754944e-38, %v107_v37  ;;  %vm106_vm4 = vcmp.eq.f32.partialorder %v105_v39, 8.507059e+37 }
 0x1ab   :  { %v184_v34 = vpop.eup %183 }
 0x1ac   :  { %v97_v35 = vmul.f32 %v184_v34, %v95_v33  ;;  %vm102_vm1 = vweird.f32 %v184_v34 }
 0x1ad   :  { %vm103_vm3 = vmor %vm101_vm2, %vm102_vm1 }
 0x1ae   :  { %v98_v36 = vsub.f32 1.0, %v97_v35 }
 0x1b0   :  { %v99_v38 = vmul.f32 %v184_v34, %v98_v36 }
 0x1b2   :  { %v100_v40 = vadd.f32 %v184_v34, %v99_v38 }
 0x1b4   :  { %v104_v42 = vsel %vm103_vm3, %v184_v34, %v100_v40 }
 0x1b5   :  { %v109_v43 = vsel %vm106_vm4, %v108_v41, %v104_v42 }
 0x1b6   :  { %v110_v44 = vmul.f32 %v182_v27, %v109_v43 }
 0x1b8   :  { %v111_v45 = vmul.f32 %v110_v44, %v58_v9 }
 0x1ba   :  { %v113_v46 = vsel %vm112_vm5, %v111_v45, 0.0 }
 0x1bb   :  { %v114_v47 = vrot.slane %v113_v46, 4 }
 0x1bd   :  { %v115_v48 = vadd.f32 %v114_v47, %v113_v46 }
 0x1bf   :  { %v116_v49 = vrot.slane %v115_v48, 2 }
 0x1c1   :  { %v117_v50 = vadd.f32 %v116_v49, %v115_v48 }
 0x1c3   :  { %v118_v51 = vrot.slane %v117_v50, 1 }
 0x1c5   :  { %v119_v52 = vadd.f32 %v118_v51, %v117_v50 }
 0x1c7   :  { %v120_v54 = vadd.f32 %v119_v52, %v247_v6 }
 0x1c9   :  { %v125_v55 = vadd.f32 %v123_v53, %v120_v54 }
 0x1cb   :  { %v127_v56 = vsel %vm126_vm6, %v125_v55, -inf }
 0x1cc   :  { %128 = vmax.xlane.f32.xlu2 %v127_v56 }
 0x23f   :  { %v129_v57 = vpop.xlane.xlu2 %128 }
 0x240   :  { %v130_v58 = vsub.f32 %v125_v55, %v129_v57 }
 0x242   :  { %v131_v59 = vmul.f32 1.442695, %v130_v58 }
 0x244   :  { %185 = vpow2.f32 %v131_v59 }
 0x24a   :  { %v186_v60 = vpop.eup %185 }
 0x24b   :  { %134 = vrot.lane.b32.xlu2 %v186_v60, %s219_s20 }
 0x2a5   :  { %v135_v61 = vpop.permute.xlu2 %134 }
 0x2a6   :  { %v138_v62 = vsel %vm137_vm7, %v135_v61, 0.0 }
 0x2a7   :  { %139 = vadd.xlane.f32.xlu0 %v138_v62 }
 0x31a   :  { %v140_v63 = vpop.xlane.xlu0 %139 }
 0x31b   :  { %187 = vrcp.f32 %v140_v63  ;;  %v152_v3 = vand.u32 2147483648, %v140_v63  ;;  %v150_v5 = vand.u32 2147483647, %v140_v63  ;;  %vm146_vm9 = vweird.f32 %v140_v63 }
 0x31d   :  { %v153_v7 = vor.u32 1.1754944e-38, %v152_v3  ;;  %vm151_vm11 = vcmp.eq.f32.partialorder %v150_v5, 8.507059e+37 }
 0x321   :  { %v188_v0 = vpop.eup %187 }
 0x322   :  { %v142_v1 = vmul.f32 %v188_v0, %v140_v63  ;;  %vm147_vm8 = vweird.f32 %v188_v0 }
 0x323   :  { %vm148_vm10 = vmor %vm146_vm9, %vm147_vm8 }
 0x324   :  { %v143_v2 = vsub.f32 1.0, %v142_v1 }
 0x326   :  { %v144_v4 = vmul.f32 %v188_v0, %v143_v2 }
 0x328   :  { %v145_v6 = vadd.f32 %v188_v0, %v144_v4 }
 0x32a   :  { %v149_v8 = vsel %vm148_vm10, %v188_v0, %v145_v6 }
 0x32b   :  { %v154_v9 = vsel %vm151_vm11, %v153_v7, %v149_v8 }
 0x32c   :  { %v155_v10 = vmul.f32 %v186_v60, %v154_v9 }
 0x32e   :  { %157 = vrot.lane.b32.xlu2 %v155_v10, %s219_s20 }
 0x388   :  { %v158_v11 = vpop.permute.xlu2 %157 }
 0x389   :  { %160 = vst.msk [vmem:[%s262_s2] sm:$0x1] %vm137_vm7, %v158_v11 }
 0x38a   :  { %165 = vsyncpa [#allocation3], 1 }

</bundles_post_ra>
